<compile_context>
chip_gen: v6e
topology: v6e:2x2x1
jax: 0.10.0
libtpu: 0.0.40
codegen_flags: <defaults>
</compile_context>

<pallas_src>
import jax
import jax.numpy as jnp
from jax.experimental import pallas as pl
from jax.experimental.pallas import tpu as pltpu


def _round_up(x: int, m: int) -> int:
    return ((x + m - 1) // m) * m


def _gcn_spmm_kernel(bids_ref, cnts_ref, adj_ref, emb_ref, out_ref):
    # grid = (row blocks, K-reduction blocks); out block index ignores k, so
    # the f32 output tile stays VMEM-resident and doubles as the accumulator.
    i = pl.program_id(0)
    k = pl.program_id(1)

    @pl.when(k == 0)
    def _init():
        out_ref[...] = jnp.zeros_like(out_ref)

    # Only accumulate for the non-empty adjacency blocks of this row block.
    @pl.when(k < cnts_ref[i])
    def _accumulate():
        out_ref[...] += jnp.dot(
            adj_ref[...], emb_ref[...], preferred_element_type=jnp.float32
        )


def gcn_layer(
    adj: jax.Array,
    embeds: jax.Array,
    *,
    tm: int | None = None,
    tk: int | None = None,
    compute_dtype=jnp.bfloat16,
    skip_zero_blocks: bool = True,
) -> jax.Array:
    """Pallas equivalent of GCNLayer.forward: out = adj @ embeds (f32 output)."""
    M, K = adj.shape
    K2, D = embeds.shape
    assert K == K2, "adj columns must match embeds rows"

    # ---- tile selection (memory-bound on the adj stream: big aligned tiles) ----
    itemsize = jnp.dtype(compute_dtype).itemsize
    if tm is None:
        tm = min(512, _round_up(M, 8))
    if tk is None:
        tk = min(1024, _round_up(K, 128))

    def _working_set(tm_, tk_):
        # double-buffered adj + embeds inputs, double-buffered f32 output tile
        return 2 * (tm_ * tk_ * itemsize + tk_ * D * itemsize + tm_ * D * 4)

    budget = 12 * 1024 * 1024  # fits v5e's 16 MiB default scoped VMEM too
    while tk > 128 and _working_set(tm, tk) > budget:
        tk = max(128, _round_up(tk // 2, 128))
    while tm > 8 and _working_set(tm, tk) > budget:
        tm = max(8, _round_up(tm // 2, 8))

    # ---- pad to tile multiples (real graph sizes rarely divide evenly) ----
    M_pad = _round_up(M, tm)
    K_pad = _round_up(K, tk)
    adj_p = adj
    emb_p = embeds
    if (M_pad, K_pad) != (M, K):
        adj_p = jnp.pad(adj, ((0, M_pad - M), (0, K_pad - K)))
    if K_pad != K:
        emb_p = jnp.pad(embeds, ((0, K_pad - K), (0, 0)))

    Mb, Kb = M_pad // tm, K_pad // tk

    # ---- block-level sparsity structure (scalar-prefetched block-CSR) ----
    if skip_zero_blocks:
        blk_nonzero = jnp.any(
            adj_p.reshape(Mb, tm, Kb, tk) != 0, axis=(1, 3)
        )  # [Mb, Kb]
        counts = jnp.sum(blk_nonzero, axis=1).astype(jnp.int32)  # [Mb]
        # non-empty block ids first; pad tail by clamping to the last real id
        order = jnp.argsort(jnp.logical_not(blk_nonzero).astype(jnp.int32), axis=1)
        ks = jnp.arange(Kb, dtype=jnp.int32)[None, :]
        clamped = jnp.minimum(ks, jnp.maximum(counts[:, None] - 1, 0))
        block_ids = jnp.take_along_axis(order, clamped, axis=1).astype(jnp.int32)
    else:
        counts = jnp.full((Mb,), Kb, dtype=jnp.int32)
        block_ids = jnp.tile(jnp.arange(Kb, dtype=jnp.int32)[None, :], (Mb, 1))
    bids_flat = block_ids.reshape(-1)  # 1-D to keep SMEM padding small

    # ---- bf16 inputs, f32 accumulation / output ----
    adj_c = adj_p.astype(compute_dtype)
    emb_c = emb_p.astype(compute_dtype)

    adj_map = lambda i, k, bids, cnts: (i, bids[i * Kb + k])
    emb_map = lambda i, k, bids, cnts: (bids[i * Kb + k], 0)
    out_map = lambda i, k, bids, cnts: (i, 0)

    out = pl.pallas_call(
        _gcn_spmm_kernel,
        out_shape=jax.ShapeDtypeStruct((M_pad, D), jnp.float32),
        grid_spec=pltpu.PrefetchScalarGridSpec(
            num_scalar_prefetch=2,
            grid=(Mb, Kb),
            in_specs=[
                pl.BlockSpec((tm, tk), adj_map),  # adjacency tile (bf16)
                pl.BlockSpec((tk, D), emb_map),   # full-width embeds panel (bf16)
            ],
            out_specs=pl.BlockSpec((tm, D), out_map),
        ),
        compiler_params=pltpu.CompilerParams(
            dimension_semantics=("parallel", "arbitrary")
        ),
        cost_estimate=pl.CostEstimate(
            flops=2 * M_pad * K_pad * D,
            transcendentals=0,
            bytes_accessed=(
                adj_c.size * jnp.dtype(compute_dtype).itemsize
                + emb_c.size * jnp.dtype(compute_dtype).itemsize
                + M_pad * D * 4
            ),
        ),
    )(bids_flat, counts, adj_c, emb_c)

    return out[:M] if M_pad != M else out


def _make_graph(key, n, d):
    k_adj, k_emb, k_mask = jax.random.split(key, 3)
    raw = jax.random.uniform(k_adj, (n, n), dtype=jnp.float32)
    mask = (jax.random.uniform(k_mask, (n, n)) < 0.1).astype(jnp.float32)
    adj = raw * mask + jnp.eye(n, dtype=jnp.float32)  # self-loops
    adj = adj / jnp.sum(adj, axis=1, keepdims=True)   # row-normalize
    embeds = jax.random.normal(k_emb, (n, d), dtype=jnp.float32)
    return adj, embeds


if __name__ == "__main__":
    key = jax.random.PRNGKey(0)
    k1, k2 = jax.random.split(key)

    # Small demo graph (single grid step on the fast path).
    adj, embeds = _make_graph(k1, 256, 128)
    out = jax.block_until_ready(gcn_layer(adj, embeds))
    ref = adj @ embeds
    assert out.shape == ref.shape
    assert float(jnp.max(jnp.abs(out - ref))) < 3e-2, "demo mismatch"

    # Larger, non-tile-aligned graph: exercises padding, multi-block reduction
    # and the zero-block skipping path.
    adj2, embeds2 = _make_graph(k2, 1152, 256)
    out2 = jax.block_until_ready(gcn_layer(adj2, embeds2))
    ref2 = adj2 @ embeds2
    assert out2.shape == ref2.shape
    assert float(jnp.max(jnp.abs(out2 - ref2))) < 3e-2, "large-graph mismatch"

    print("KERNEL_OK")
</pallas_src>

<mosaic_0001>
module attributes {stable_mosaic.version = 11 : i64} {
  func.func @_gcn_spmm_kernel(%arg0: i32, %arg1: i32, %arg2: memref<1xi32, #tpu.memory_space<smem>>, %arg3: memref<1xi32, #tpu.memory_space<smem>>, %arg4: memref<256x256xbf16, #tpu.memory_space<vmem>>, %arg5: memref<256x128xbf16, #tpu.memory_space<vmem>>, %arg6: memref<256x128xf32, #tpu.memory_space<vmem>>) attributes {dimension_semantics = [#tpu.dimension_semantics<parallel>, #tpu.dimension_semantics<arbitrary>], iteration_bounds = array<i64: 1, 1>, scalar_prefetch = 2 : i64, scratch_operands = 0 : i64, tpu.core_type = #tpu.core_type<tc>, window_params = [{transform_indices = @transform_0, window_bounds = array<i64: 256, 256>}, {transform_indices = @transform_1, window_bounds = array<i64: 256, 128>}, {transform_indices = @transform_2, window_bounds = array<i64: 256, 128>}]} {
    %c0_i32 = arith.constant 0 : i32
    %0 = arith.cmpi eq, %arg1, %c0_i32 : i32
    %1 = arith.extui %0 : i1 to i32
    %c0_i32_0 = arith.constant 0 : i32
    %2 = arith.cmpi ne, %1, %c0_i32_0 : i32
    scf.if %2 {
      %cst = arith.constant 0.000000e+00 : f32
      %8 = vector.broadcast %cst : f32 to vector<256x128xf32>
      %c0 = arith.constant 0 : index
      %c0_2 = arith.constant 0 : index
      %9 = vector.load %arg6[%c0, %c0_2] : memref<256x128xf32, #tpu.memory_space<vmem>>, vector<256x128xf32>
      tpu.vector_store %arg6[%c0, %c0_2], %8 {strides = array<i32>} : memref<256x128xf32, #tpu.memory_space<vmem>>, vector<256x128xf32>,
    } else {
    }
    %3 = arith.index_cast %arg0 : i32 to index
    %4 = memref.load %arg3[%3] : memref<1xi32, #tpu.memory_space<smem>>
    %5 = arith.cmpi slt, %arg1, %4 : i32
    %6 = arith.extui %5 : i1 to i32
    %c0_i32_1 = arith.constant 0 : i32
    %7 = arith.cmpi ne, %6, %c0_i32_1 : i32
    scf.if %7 {
      %c0 = arith.constant 0 : index
      %c0_2 = arith.constant 0 : index
      %8 = vector.load %arg6[%c0, %c0_2] : memref<256x128xf32, #tpu.memory_space<vmem>>, vector<256x128xf32>
      %c0_3 = arith.constant 0 : index
      %c0_4 = arith.constant 0 : index
      %9 = vector.load %arg4[%c0_3, %c0_4] : memref<256x256xbf16, #tpu.memory_space<vmem>>, vector<256x256xbf16>
      %c0_5 = arith.constant 0 : index
      %c0_6 = arith.constant 0 : index
      %10 = vector.load %arg5[%c0_5, %c0_6] : memref<256x128xbf16, #tpu.memory_space<vmem>>, vector<256x128xbf16>
      %cst = arith.constant dense<0.000000e+00> : vector<256x128xf32>
      %11 = tpu.matmul %9, %10, %cst {dimension_numbers = #tpu.dot_dimension_numbers<[1], [0], [0], [1], [0, 0, 1, 1], [], []>} : vector<256x256xbf16>, vector<256x128xbf16>, vector<256x128xf32> -> vector<256x128xf32>
      %12 = arith.addf %8, %11 : vector<256x128xf32>
      %c0_7 = arith.constant 0 : index
      %c0_8 = arith.constant 0 : index
      %13 = vector.load %arg6[%c0_7, %c0_8] : memref<256x128xf32, #tpu.memory_space<vmem>>, vector<256x128xf32>
      tpu.vector_store %arg6[%c0_7, %c0_8], %12 {strides = array<i32>} : memref<256x128xf32, #tpu.memory_space<vmem>>, vector<256x128xf32>,
    } else {
    }
    return
  }
  func.func @transform_0(%arg0: i32, %arg1: i32, %arg2: memref<1xi32, #tpu.memory_space<smem>>, %arg3: memref<1xi32, #tpu.memory_space<smem>>) -> (i32, i32) {
    %c1_i32 = arith.constant 1 : i32
    %0 = arith.muli %arg0, %c1_i32 : i32
    %1 = arith.addi %0, %arg1 : i32
    %2 = arith.index_cast %1 : i32 to index
    %3 = memref.load %arg2[%2] : memref<1xi32, #tpu.memory_space<smem>>
    %c0_i32 = arith.constant 0 : i32
    return %arg0, %3 : i32, i32
  }
  func.func @transform_1(%arg0: i32, %arg1: i32, %arg2: memref<1xi32, #tpu.memory_space<smem>>, %arg3: memref<1xi32, #tpu.memory_space<smem>>) -> (i32, i32) {
    %c1_i32 = arith.constant 1 : i32
    %0 = arith.muli %arg0, %c1_i32 : i32
    %1 = arith.addi %0, %arg1 : i32
    %2 = arith.index_cast %1 : i32 to index
    %3 = memref.load %arg2[%2] : memref<1xi32, #tpu.memory_space<smem>>
    %c0_i32 = arith.constant 0 : i32
    %c0_i32_0 = arith.constant 0 : i32
    return %3, %c0_i32 : i32, i32
  }
  func.func @transform_2(%arg0: i32, %arg1: i32, %arg2: memref<1xi32, #tpu.memory_space<smem>>, %arg3: memref<1xi32, #tpu.memory_space<smem>>) -> (i32, i32) {
    %c0_i32 = arith.constant 0 : i32
    %c0_i32_0 = arith.constant 0 : i32
    return %arg0, %c0_i32 : i32, i32
  }
}

</mosaic_0001>

<bundles_post_ra>
// kernel: tpu_custom_call.1
= control target key start
LH: loop header
LB: loop body
LE: loop exit
PB: predicated region body
PF: predicated region fallthrough
CT: control target
= control target key end

     0   :  { %11 = vsyncpa [#allocation6], 0  ;;  %s1096_s0 = inlined_call_operand.<no memory space> [shape: s32[1], index: 0, kind: input, shape index: {}]   ;;  %s1097_s1 = inlined_call_operand.<no memory space> [shape: s32[1], index: 1, kind: input, shape index: {}]   ;;  %s1098_s2 = inlined_call_operand.hbm [shape: bf16[256,256], index: 2, kind: input, shape index: {}]   ;;  %s1099_s3 = inlined_call_operand.hbm [shape: bf16[256,128], index: 3, kind: input, shape index: {}]   ;;  %s1100_s4 = inlined_call_operand.hbm [shape: f32[256,128], index: 4, kind: output, shape index: {}]  }
   0x1   :  { %12 = vsyncpa [#allocation9], 0 }
   0x2   :  { %13 = vsyncpa [#allocation7], 0  ;;  %s755_s17 = sshll.u32 %s1096_s0, 7  ;;  %s1027_s21 = smov [#allocation5]  }
   0x3   :  { %s23_s20 = scalar_lea.hbm %s1098_s2, %s755_s17  ;;  %s24_s22 = sshll.u32 %s1027_s21, 4  ;;  %s25_s22 = int_to_ptr.vmem [resolvable:$true] %s24_s22 }
   0x4   :  { %s756_s25 = sshll.u32 %s1096_s0, 11  ;;  %s957_s26 = scalar_lea.hbm %s23_s20, 4096 }
   0x5   :  { %p958_p0 = scmp.ne.s32.totalorder %s23_s20, %s957_s26  ;;  %s959_s29 = scalar_lea.hbm %s1098_s2, 4096 }
   0x6   :  { %p960_p1 = scmp.lt.s32.totalorder %s23_s20, %s1098_s2  ;;  %p961_p2 = scmp.lt.s32.totalorder %s959_s29, %s957_s26 }
   0x8   :  { %p962_p3 = por %p961_p2, %p960_p1 }
   0xa   :  { %p963_p4 = pnand %p962_p3, %p958_p0 }
   0xc   :  { %966 = shalt.err (!%p963_p4)
}
   0xd   :  { %s967_s6 = scalar_lea.vmem %s25_s22, 4096  ;;  %p972_p6 = scmp.lt.s32.totalorder %s25_s22, %s25_s22 }
   0xe   :  { %p968_p5 = scmp.ne.s32.totalorder %s25_s22, %s967_s6  ;;  %p973_p7 = scmp.lt.s32.totalorder %s967_s6, %s967_s6 }
  0x10   :  { %p974_p8 = por %p973_p7, %p972_p6 }
  0x12   :  { %p975_p9 = pnand %p974_p8, %p968_p5 }
  0x14   :  { %978 = shalt.err (!%p975_p9)
}
  0x15   :  { %s1028_s0 = smov 128   ;;  %s1029_s7 = smov 8  }
  0x16   :  { %30 = dma.hbm_to_vmem [thread:$0]  %s23_s20, 4096, %s25_s22, [#allocation6], %s1028_s0, %s1028_s0, %s1029_s7  }
  0x17   :  { %s40_s2 = scalar_lea.hbm %s1099_s3, %s756_s25  ;;  %s1030_s10 = smov [#allocation8]  }
  0x18   :  { %s41_s11 = sshll.u32 %s1030_s10, 4  ;;  %s979_s12 = scalar_lea.hbm %s40_s2, 2048  ;;  %s42_s11 = int_to_ptr.vmem [resolvable:$true] %s41_s11 }
  0x19   :  { %p980_p10 = scmp.ne.s32.totalorder %s40_s2, %s979_s12  ;;  %s981_s15 = scalar_lea.hbm %s1099_s3, 2048 }
  0x1a   :  { %p982_p11 = scmp.lt.s32.totalorder %s40_s2, %s1099_s3  ;;  %p983_p12 = scmp.lt.s32.totalorder %s981_s15, %s979_s12 }
  0x1c   :  { %p984_p13 = por %p983_p12, %p982_p11 }
  0x1e   :  { %p985_p0 = pnand %p984_p13, %p980_p10 }
  0x20   :  { %988 = shalt.err (!%p985_p0)
}
  0x21   :  { %s989_s18 = scalar_lea.vmem %s42_s11, 2048  ;;  %p994_p2 = scmp.lt.s32.totalorder %s42_s11, %s42_s11 }
  0x22   :  { %p990_p1 = scmp.ne.s32.totalorder %s42_s11, %s989_s18  ;;  %p995_p3 = scmp.lt.s32.totalorder %s989_s18, %s989_s18 }
  0x24   :  { %p996_p4 = por %p995_p3, %p994_p2 }
  0x26   :  { %p997_p5 = pnand %p996_p4, %p990_p1 }
  0x28   :  { %1000 = shalt.err (!%p997_p5)
}
  0x29   :  { %s1031_s19 = smov 64   ;;  %s1032_s20 = smov 4  }
  0x2a   :  { %47 = dma.hbm_to_vmem [thread:$0]  %s40_s2, 2048, %s42_s11, [#allocation9], %s1031_s19, %s1031_s19, %s1032_s20  }
  0x2b   :  { %1021 = dma.done.wait [#allocation6], 4096  }
  0x2c   :  { %1022 = vsyncadd [#allocation6], 4294963200 }
  0x2d   :  { %1023 = dma.done.wait [#allocation9], 2048  }
  0x2e   :  { %1024 = vsyncadd [#allocation9], 4294965248  ;;  %v1033_v0 = vmov 0.0   ;;  %p706_p6 = scmp.le.s32.totalorder %s1097_s1, 0 }
  0x2f   :  { %65 = vst [vmem:[#allocation10] sm:$0xff] %v1033_v0  ;;  %66 = vst [vmem:[#allocation10 + $0x8] sm:$0xff] %v1033_v0 }
  0x30   :  { %67 = vst [vmem:[#allocation10 + $0x10] sm:$0xff] %v1033_v0  ;;  %68 = vst [vmem:[#allocation10 + $0x18] sm:$0xff] %v1033_v0 }
  0x31   :  { %69 = vst [vmem:[#allocation10 + $0x20] sm:$0xff] %v1033_v0  ;;  %70 = vst [vmem:[#allocation10 + $0x28] sm:$0xff] %v1033_v0 }
  0x32   :  { %71 = vst [vmem:[#allocation10 + $0x30] sm:$0xff] %v1033_v0  ;;  %72 = vst [vmem:[#allocation10 + $0x38] sm:$0xff] %v1033_v0 }
  0x33   :  { %73 = vst [vmem:[#allocation10 + $0x40] sm:$0xff] %v1033_v0  ;;  %74 = vst [vmem:[#allocation10 + $0x48] sm:$0xff] %v1033_v0 }
  0x34   :  { %75 = vst [vmem:[#allocation10 + $0x50] sm:$0xff] %v1033_v0  ;;  %76 = vst [vmem:[#allocation10 + $0x58] sm:$0xff] %v1033_v0 }
  0x35   :  { %77 = vst [vmem:[#allocation10 + $0x60] sm:$0xff] %v1033_v0  ;;  %78 = vst [vmem:[#allocation10 + $0x68] sm:$0xff] %v1033_v0 }
  0x36   :  { %79 = vst [vmem:[#allocation10 + $0x70] sm:$0xff] %v1033_v0  ;;  %80 = vst [vmem:[#allocation10 + $0x78] sm:$0xff] %v1033_v0 }
  0x37   :  { %81 = vst [vmem:[#allocation10 + $0x80] sm:$0xff] %v1033_v0  ;;  %82 = vst [vmem:[#allocation10 + $0x88] sm:$0xff] %v1033_v0 }
  0x38   :  { %83 = vst [vmem:[#allocation10 + $0x90] sm:$0xff] %v1033_v0  ;;  %84 = vst [vmem:[#allocation10 + $0x98] sm:$0xff] %v1033_v0 }
  0x39   :  { %85 = vst [vmem:[#allocation10 + $0xa0] sm:$0xff] %v1033_v0  ;;  %86 = vst [vmem:[#allocation10 + $0xa8] sm:$0xff] %v1033_v0 }
  0x3a   :  { %87 = vst [vmem:[#allocation10 + $0xb0] sm:$0xff] %v1033_v0  ;;  %88 = vst [vmem:[#allocation10 + $0xb8] sm:$0xff] %v1033_v0  ;;  %101 = sbr.rel (%p706_p6) target bundleno = 356 (0x164), region = 25 }
  0x3b   :  { %89 = vst [vmem:[#allocation10 + $0xc0] sm:$0xff] %v1033_v0  ;;  %90 = vst [vmem:[#allocation10 + $0xc8] sm:$0xff] %v1033_v0 }
  0x3c   :  { %91 = vst [vmem:[#allocation10 + $0xd0] sm:$0xff] %v1033_v0  ;;  %92 = vst [vmem:[#allocation10 + $0xd8] sm:$0xff] %v1033_v0 }
  0x3d   :  { %93 = vst [vmem:[#allocation10 + $0xe0] sm:$0xff] %v1033_v0  ;;  %94 = vst [vmem:[#allocation10 + $0xe8] sm:$0xff] %v1033_v0 }
  0x3e   :  { %95 = vst [vmem:[#allocation10 + $0xf0] sm:$0xff] %v1033_v0  ;;  %96 = vst [vmem:[#allocation10 + $0xf8] sm:$0xff] %v1033_v0 }
  0x3f   :  { %v893_v1 = vld [vmem:[#allocation8 + $0x78] sm:$0xff]   ;;  %v895_v3 = vld [vmem:[#allocation8 + $0x70] sm:$0xff]   ;;  %v897_v5 = vld [vmem:[#allocation8 + $0x68] sm:$0xff]  }
  0x40   :  { %v894_v2 = vld [vmem:[#allocation8 + $0x38] sm:$0xff]   ;;  %757 = vmatprep.subr.bf16.mxu0 %v893_v1  ;;  %869 = vmatprep.subr.bf16.mxu1 %v893_v1  ;;  %v896_v4 = vld [vmem:[#allocation8 + $0x30] sm:$0xff]   ;;  %v898_v6 = vld [vmem:[#allocation8 + $0x28] sm:$0xff]  }
  0x41   :  { %758 = vmatpush3.bf16.msra.mxu0 %v894_v2  ;;  %877 = vmatpush3.bf16.msra.mxu1 %v894_v2  ;;  %v899_v7 = vld [vmem:[#allocation8 + $0x60] sm:$0xff]   ;;  %v901_v9 = vld [vmem:[#allocation8 + $0x58] sm:$0xff]   ;;  %v903_v11 = vld [vmem:[#allocation8 + $0x50] sm:$0xff]  }
  0x42   :  { %759 = vmatprep.subr.bf16.mxu0 %v895_v3  ;;  %870 = vmatprep.subr.bf16.mxu1 %v895_v3  ;;  %v900_v8 = vld [vmem:[#allocation8 + $0x20] sm:$0xff]   ;;  %v902_v10 = vld [vmem:[#allocation8 + $0x18] sm:$0xff]   ;;  %v904_v14 = vld [vmem:[#allocation8 + $0x10] sm:$0xff]  }
  0x43   :  { %v911_v12 = vld [vmem:[#allocation5 + $0x4] ss:$8 sps:$4 sm:$0xff]   ;;  %v909_v19 = vld [vmem:[#allocation5] ss:$8 sps:$4 sm:$0xff]   ;;  %v915_v21 = vld [vmem:[#allocation5 + $0x14] ss:$8 sps:$4 sm:$0xff]  }
  0x44   :  { %v914_v13 = vld [vmem:[#allocation5 + $0x84] ss:$8 sps:$4 sm:$0xff]   ;;  %486 = vmatprep.mubr.bf16.mxu0 %v911_v12  ;;  %v912_v20 = vld [vmem:[#allocation5 + $0x80] ss:$8 sps:$4 sm:$0xff]   ;;  %v917_v22 = vld [vmem:[#allocation5 + $0x94] ss:$8 sps:$4 sm:$0xff]  }
  0x45   :  { %760 = vmatpush3.bf16.msra.mxu0 %v896_v4  ;;  %878 = vmatpush3.bf16.msra.mxu1 %v896_v4  ;;  %v905_v15 = vld [vmem:[#allocation8 + $0x48] sm:$0xff]   ;;  %v907_v17 = vld [vmem:[#allocation8 + $0x40] sm:$0xff]   ;;  %v919_v23 = vld [vmem:[#allocation5 + $0x10] ss:$8 sps:$4 sm:$0xff]  }
  0x46   :  { %761 = vmatprep.subr.bf16.mxu0 %v897_v5  ;;  %871 = vmatprep.subr.bf16.mxu1 %v897_v5  ;;  %v906_v16 = vld [vmem:[#allocation8 + $0x8] sm:$0xff]   ;;  %v908_v18 = vld [vmem:[#allocation8] sm:$0xff]   ;;  %v920_v24 = vld [vmem:[#allocation5 + $0x90] ss:$8 sps:$4 sm:$0xff]  }
  0x47   :  { %550 = vmatprep.mubr.bf16.mxu1 %v914_v13  ;;  %v921_v25 = vld [vmem:[#allocation5 + $0x24] ss:$8 sps:$4 sm:$0xff]   ;;  %v925_v27 = vld [vmem:[#allocation5 + $0x20] ss:$8 sps:$4 sm:$0xff]   ;;  %v927_v29 = vld [vmem:[#allocation5 + $0x34] ss:$8 sps:$4 sm:$0xff]  }
  0x48   :  { %v923_v26 = vld [vmem:[#allocation5 + $0xa4] ss:$8 sps:$4 sm:$0xff]   ;;  %v926_v28 = vld [vmem:[#allocation5 + $0xa0] ss:$8 sps:$4 sm:$0xff]   ;;  %v929_v30 = vld [vmem:[#allocation5 + $0xb4] ss:$8 sps:$4 sm:$0xff]  }
  0x49   :  { %762 = vmatpush3.bf16.msra.mxu0 %v898_v6  ;;  %879 = vmatpush3.bf16.msra.mxu1 %v898_v6  ;;  %v931_v31 = vld [vmem:[#allocation5 + $0x30] ss:$8 sps:$4 sm:$0xff]   ;;  %v933_v33 = vld [vmem:[#allocation5 + $0x44] ss:$8 sps:$4 sm:$0xff]   ;;  %v937_v35 = vld [vmem:[#allocation5 + $0x40] ss:$8 sps:$4 sm:$0xff]  }
  0x4a   :  { %763 = vmatprep.subr.bf16.mxu0 %v899_v7  ;;  %872 = vmatprep.subr.bf16.mxu1 %v899_v7  ;;  %v932_v32 = vld [vmem:[#allocation5 + $0xb0] ss:$8 sps:$4 sm:$0xff]   ;;  %v935_v34 = vld [vmem:[#allocation5 + $0xc4] ss:$8 sps:$4 sm:$0xff]   ;;  %v938_v36 = vld [vmem:[#allocation5 + $0xc0] ss:$8 sps:$4 sm:$0xff]  }
  0x4b   :  { %v939_v37 = vld [vmem:[#allocation5 + $0x54] ss:$8 sps:$4 sm:$0xff]   ;;  %v943_v39 = vld [vmem:[#allocation5 + $0x50] ss:$8 sps:$4 sm:$0xff]   ;;  %v945_v41 = vld [vmem:[#allocation5 + $0x64] ss:$8 sps:$4 sm:$0xff]  }
  0x4c   :  { %v941_v38 = vld [vmem:[#allocation5 + $0xd4] ss:$8 sps:$4 sm:$0xff]   ;;  %v944_v40 = vld [vmem:[#allocation5 + $0xd0] ss:$8 sps:$4 sm:$0xff]   ;;  %v947_v42 = vld [vmem:[#allocation5 + $0xe4] ss:$8 sps:$4 sm:$0xff]  }
  0x4d   :  { %764 = vmatpush3.bf16.msra.mxu0 %v900_v8  ;;  %880 = vmatpush3.bf16.msra.mxu1 %v900_v8  ;;  %v949_v43 = vld [vmem:[#allocation5 + $0x60] ss:$8 sps:$4 sm:$0xff]   ;;  %v951_v45 = vld [vmem:[#allocation5 + $0x74] ss:$8 sps:$4 sm:$0xff]   ;;  %v955_v47 = vld [vmem:[#allocation5 + $0x70] ss:$8 sps:$4 sm:$0xff]  }
  0x4e   :  { %765 = vmatprep.subr.bf16.mxu0 %v901_v9  ;;  %873 = vmatprep.subr.bf16.mxu1 %v901_v9  ;;  %v950_v44 = vld [vmem:[#allocation5 + $0xe0] ss:$8 sps:$4 sm:$0xff]   ;;  %v953_v46 = vld [vmem:[#allocation5 + $0xf4] ss:$8 sps:$4 sm:$0xff]   ;;  %v956_v48 = vld [vmem:[#allocation5 + $0xf0] ss:$8 sps:$4 sm:$0xff]  }
  0x4f   :  { %v102_v51 = vld [vmem:[#allocation10] sm:$0xff]  ;;  %v103_v61 = vld [vmem:[#allocation10 + $0x8] sm:$0xff]  ;;  %v104_v7 = vld [vmem:[#allocation10 + $0x10] sm:$0xff] }
  0x50   :  { %v118_v53 = vld [vmem:[#allocation10 + $0x80] sm:$0xff]  ;;  %v119_v63 = vld [vmem:[#allocation10 + $0x88] sm:$0xff]  ;;  %v120_v9 = vld [vmem:[#allocation10 + $0x90] sm:$0xff] }
  0x51   :  { %766 = vmatpush3.bf16.msra.mxu0 %v902_v10  ;;  %881 = vmatpush3.bf16.msra.mxu1 %v902_v10 }
  0x52   :  { %767 = vmatprep.subr.bf16.mxu0 %v903_v11  ;;  %874 = vmatprep.subr.bf16.mxu1 %v903_v11 }
  0x55   :  { %768 = vmatpush3.bf16.msra.mxu0 %v904_v14  ;;  %882 = vmatpush3.bf16.msra.mxu1 %v904_v14 }
  0x56   :  { %769 = vmatprep.subr.bf16.mxu0 %v905_v15  ;;  %875 = vmatprep.subr.bf16.mxu1 %v905_v15 }
  0x59   :  { %770 = vmatpush3.bf16.msra.mxu0 %v906_v16  ;;  %883 = vmatpush3.bf16.msra.mxu1 %v906_v16 }
  0x5a   :  { %771 = vmatprep.subr.bf16.mxu0 %v907_v17  ;;  %876 = vmatprep.subr.bf16.mxu1 %v907_v17  ;;  %v105_v17 = vld [vmem:[#allocation10 + $0x18] sm:$0xff] }
  0x5d   :  { %772 = vmatpush3.bf16.msra.mxu0 %v908_v18  ;;  %884 = vmatpush3.bf16.msra.mxu1 %v908_v18 }
  0x60   :  { %487 = vmatmul.mubr.bf16.vlgmr.msra.gmra.mxu0 %v909_v19  ;;  %551 = vmatmul.mubr.bf16.vlgmr.msra.gmra.mxu1 %v912_v20  ;;  %v121_v19 = vld [vmem:[#allocation10 + $0x98] sm:$0xff] }
  0x61   :  { %494 = vmatprep.mubr.bf16.mxu0 %v915_v21  ;;  %558 = vmatprep.mubr.bf16.mxu1 %v917_v22 }
  0x68   :  { %495 = vmatmul.mubr.bf16.gmra.mxu0 %v919_v23  ;;  %559 = vmatmul.mubr.bf16.gmra.mxu1 %v920_v24 }
  0x69   :  { %502 = vmatprep.mubr.bf16.mxu0 %v921_v25  ;;  %566 = vmatprep.mubr.bf16.mxu1 %v923_v26 }
  0x70   :  { %503 = vmatmul.mubr.bf16.gmra.mxu0 %v925_v27  ;;  %567 = vmatmul.mubr.bf16.gmra.mxu1 %v926_v28  ;;  %v106_v27 = vld [vmem:[#allocation10 + $0x20] sm:$0xff] }
  0x71   :  { %510 = vmatprep.mubr.bf16.mxu0 %v927_v29  ;;  %574 = vmatprep.mubr.bf16.mxu1 %v929_v30  ;;  %v122_v29 = vld [vmem:[#allocation10 + $0xa0] sm:$0xff] }
  0x78   :  { %511 = vmatmul.mubr.bf16.gmra.mxu0 %v931_v31  ;;  %575 = vmatmul.mubr.bf16.gmra.mxu1 %v932_v32 }
  0x79   :  { %518 = vmatprep.mubr.bf16.mxu0 %v933_v33  ;;  %582 = vmatprep.mubr.bf16.mxu1 %v935_v34 }
  0x80   :  { %519 = vmatmul.mubr.bf16.gmra.mxu0 %v937_v35  ;;  %583 = vmatmul.mubr.bf16.gmra.mxu1 %v938_v36 }
  0x81   :  { %526 = vmatprep.mubr.bf16.mxu0 %v939_v37  ;;  %590 = vmatprep.mubr.bf16.mxu1 %v941_v38  ;;  %v107_v37 = vld [vmem:[#allocation10 + $0x28] sm:$0xff] }
  0x88   :  { %527 = vmatmul.mubr.bf16.gmra.mxu0 %v943_v39  ;;  %591 = vmatmul.mubr.bf16.gmra.mxu1 %v944_v40  ;;  %v123_v39 = vld [vmem:[#allocation10 + $0xa8] sm:$0xff] }
  0x89   :  { %534 = vmatprep.mubr.bf16.mxu0 %v945_v41  ;;  %598 = vmatprep.mubr.bf16.mxu1 %v947_v42 }
  0x90   :  { %535 = vmatmul.mubr.bf16.gmra.mxu0 %v949_v43  ;;  %599 = vmatmul.mubr.bf16.gmra.mxu1 %v950_v44 }
  0x91   :  { %542 = vmatprep.mubr.bf16.mxu0 %v951_v45  ;;  %606 = vmatprep.mubr.bf16.mxu1 %v953_v46 }
  0x98   :  { %543 = vmatmul.mubr.bf16.gmra.mxu0 %v955_v47  ;;  %607 = vmatmul.mubr.bf16.gmra.mxu1 %v956_v48  ;;  %v108_v47 = vld [vmem:[#allocation10 + $0x30] sm:$0xff] }
 0x120   :  { %v773_v49 = vpop.f32.mrf.mxu0  ;;  %v821_v50 = vpop.f32.mrf.mxu1 }
 0x122   :  { %v774_v52 = vpop.f32.mrf.mxu0  ;;  %v822_v54 = vpop.f32.mrf.mxu1 }
 0x123   :  { %v775_v55 = vadd.f32 %v774_v52, %v773_v49  ;;  %v823_v56 = vadd.f32 %v822_v54, %v821_v50  ;;  %v124_v49 = vld [vmem:[#allocation10 + $0xb0] sm:$0xff] }
 0x124   :  { %v776_v57 = vpop.f32.mrf.mxu0  ;;  %v824_v58 = vpop.f32.mrf.mxu1 }
 0x125   :  { %v615_v59 = vadd.f32 %v775_v55, %v102_v51  ;;  %v631_v60 = vadd.f32 %v823_v56, %v118_v53 }
 0x126   :  { %v777_v62 = vpop.f32.mrf.mxu0  ;;  %v825_v0 = vpop.f32.mrf.mxu1 }
 0x127   :  { %647 = vst [vmem:[#allocation10] sm:$0xff] %v615_v59  ;;  %663 = vst [vmem:[#allocation10 + $0x80] sm:$0xff] %v631_v60  ;;  %v778_v1 = vadd.f32 %v777_v62, %v776_v57  ;;  %v826_v2 = vadd.f32 %v825_v0, %v824_v58  ;;  %v109_v57 = vld [vmem:[#allocation10 + $0x38] sm:$0xff] }
 0x128   :  { %v779_v3 = vpop.f32.mrf.mxu0  ;;  %v827_v4 = vpop.f32.mrf.mxu1  ;;  %v125_v59 = vld [vmem:[#allocation10 + $0xb8] sm:$0xff] }
 0x129   :  { %v616_v5 = vadd.f32 %v778_v1, %v103_v61  ;;  %v632_v6 = vadd.f32 %v826_v2, %v119_v63 }
 0x12a   :  { %v780_v8 = vpop.f32.mrf.mxu0  ;;  %v828_v10 = vpop.f32.mrf.mxu1 }
 0x12b   :  { %648 = vst [vmem:[#allocation10 + $0x8] sm:$0xff] %v616_v5  ;;  %664 = vst [vmem:[#allocation10 + $0x88] sm:$0xff] %v632_v6  ;;  %v781_v11 = vadd.f32 %v780_v8, %v779_v3  ;;  %v829_v12 = vadd.f32 %v828_v10, %v827_v4  ;;  %v110_v3 = vld [vmem:[#allocation10 + $0x40] sm:$0xff] }
 0x12c   :  { %v782_v13 = vpop.f32.mrf.mxu0  ;;  %v830_v14 = vpop.f32.mrf.mxu1  ;;  %v126_v5 = vld [vmem:[#allocation10 + $0xc0] sm:$0xff] }
 0x12d   :  { %v617_v15 = vadd.f32 %v781_v11, %v104_v7  ;;  %v633_v16 = vadd.f32 %v829_v12, %v120_v9 }
 0x12e   :  { %v783_v18 = vpop.f32.mrf.mxu0  ;;  %v831_v20 = vpop.f32.mrf.mxu1 }
 0x12f   :  { %649 = vst [vmem:[#allocation10 + $0x10] sm:$0xff] %v617_v15  ;;  %665 = vst [vmem:[#allocation10 + $0x90] sm:$0xff] %v633_v16  ;;  %v784_v21 = vadd.f32 %v783_v18, %v782_v13  ;;  %v832_v22 = vadd.f32 %v831_v20, %v830_v14  ;;  %v111_v13 = vld [vmem:[#allocation10 + $0x48] sm:$0xff] }
 0x130   :  { %v785_v23 = vpop.f32.mrf.mxu0  ;;  %v833_v24 = vpop.f32.mrf.mxu1  ;;  %v127_v15 = vld [vmem:[#allocation10 + $0xc8] sm:$0xff] }
 0x131   :  { %v618_v25 = vadd.f32 %v784_v21, %v105_v17  ;;  %v634_v26 = vadd.f32 %v832_v22, %v121_v19 }
 0x132   :  { %v786_v28 = vpop.f32.mrf.mxu0  ;;  %v834_v30 = vpop.f32.mrf.mxu1 }
 0x133   :  { %650 = vst [vmem:[#allocation10 + $0x18] sm:$0xff] %v618_v25  ;;  %666 = vst [vmem:[#allocation10 + $0x98] sm:$0xff] %v634_v26  ;;  %v787_v31 = vadd.f32 %v786_v28, %v785_v23  ;;  %v835_v32 = vadd.f32 %v834_v30, %v833_v24  ;;  %v112_v23 = vld [vmem:[#allocation10 + $0x50] sm:$0xff] }
 0x134   :  { %v788_v33 = vpop.f32.mrf.mxu0  ;;  %v836_v34 = vpop.f32.mrf.mxu1  ;;  %v128_v25 = vld [vmem:[#allocation10 + $0xd0] sm:$0xff] }
 0x135   :  { %v619_v35 = vadd.f32 %v787_v31, %v106_v27  ;;  %v635_v36 = vadd.f32 %v835_v32, %v122_v29 }
 0x136   :  { %v789_v38 = vpop.f32.mrf.mxu0  ;;  %v837_v40 = vpop.f32.mrf.mxu1 }
 0x137   :  { %651 = vst [vmem:[#allocation10 + $0x20] sm:$0xff] %v619_v35  ;;  %667 = vst [vmem:[#allocation10 + $0xa0] sm:$0xff] %v635_v36  ;;  %v790_v41 = vadd.f32 %v789_v38, %v788_v33  ;;  %v838_v42 = vadd.f32 %v837_v40, %v836_v34  ;;  %v113_v33 = vld [vmem:[#allocation10 + $0x58] sm:$0xff] }
 0x138   :  { %v791_v43 = vpop.f32.mrf.mxu0  ;;  %v839_v44 = vpop.f32.mrf.mxu1  ;;  %v129_v35 = vld [vmem:[#allocation10 + $0xd8] sm:$0xff] }
 0x139   :  { %v620_v45 = vadd.f32 %v790_v41, %v107_v37  ;;  %v636_v46 = vadd.f32 %v838_v42, %v123_v39 }
 0x13a   :  { %v792_v48 = vpop.f32.mrf.mxu0  ;;  %v840_v50 = vpop.f32.mrf.mxu1 }
 0x13b   :  { %652 = vst [vmem:[#allocation10 + $0x28] sm:$0xff] %v620_v45  ;;  %668 = vst [vmem:[#allocation10 + $0xa8] sm:$0xff] %v636_v46  ;;  %v793_v51 = vadd.f32 %v792_v48, %v791_v43  ;;  %v841_v52 = vadd.f32 %v840_v50, %v839_v44  ;;  %v114_v43 = vld [vmem:[#allocation10 + $0x60] sm:$0xff] }
 0x13c   :  { %v794_v53 = vpop.f32.mrf.mxu0  ;;  %v842_v54 = vpop.f32.mrf.mxu1  ;;  %v130_v45 = vld [vmem:[#allocation10 + $0xe0] sm:$0xff] }
 0x13d   :  { %v621_v55 = vadd.f32 %v793_v51, %v108_v47  ;;  %v637_v56 = vadd.f32 %v841_v52, %v124_v49 }
 0x13e   :  { %v795_v58 = vpop.f32.mrf.mxu0  ;;  %v843_v60 = vpop.f32.mrf.mxu1 }
 0x13f   :  { %653 = vst [vmem:[#allocation10 + $0x30] sm:$0xff] %v621_v55  ;;  %669 = vst [vmem:[#allocation10 + $0xb0] sm:$0xff] %v637_v56  ;;  %v796_v61 = vadd.f32 %v795_v58, %v794_v53  ;;  %v844_v62 = vadd.f32 %v843_v60, %v842_v54  ;;  %v115_v53 = vld [vmem:[#allocation10 + $0x68] sm:$0xff] }
 0x140   :  { %v797_v63 = vpop.f32.mrf.mxu0  ;;  %v845_v0 = vpop.f32.mrf.mxu1  ;;  %v131_v55 = vld [vmem:[#allocation10 + $0xe8] sm:$0xff] }
 0x141   :  { %v622_v1 = vadd.f32 %v796_v61, %v109_v57  ;;  %v638_v2 = vadd.f32 %v844_v62, %v125_v59 }
 0x142   :  { %v798_v4 = vpop.f32.mrf.mxu0  ;;  %v846_v6 = vpop.f32.mrf.mxu1 }
 0x143   :  { %654 = vst [vmem:[#allocation10 + $0x38] sm:$0xff] %v622_v1  ;;  %670 = vst [vmem:[#allocation10 + $0xb8] sm:$0xff] %v638_v2  ;;  %v799_v7 = vadd.f32 %v798_v4, %v797_v63  ;;  %v847_v8 = vadd.f32 %v846_v6, %v845_v0  ;;  %v116_v63 = vld [vmem:[#allocation10 + $0x70] sm:$0xff] }
 0x144   :  { %v800_v9 = vpop.f32.mrf.mxu0  ;;  %v848_v10 = vpop.f32.mrf.mxu1  ;;  %v132_v1 = vld [vmem:[#allocation10 + $0xf0] sm:$0xff] }
 0x145   :  { %v623_v11 = vadd.f32 %v799_v7, %v110_v3  ;;  %v639_v12 = vadd.f32 %v847_v8, %v126_v5 }
 0x146   :  { %v801_v14 = vpop.f32.mrf.mxu0  ;;  %v849_v16 = vpop.f32.mrf.mxu1 }
 0x147   :  { %655 = vst [vmem:[#allocation10 + $0x40] sm:$0xff] %v623_v11  ;;  %671 = vst [vmem:[#allocation10 + $0xc0] sm:$0xff] %v639_v12  ;;  %v802_v17 = vadd.f32 %v801_v14, %v800_v9  ;;  %v850_v18 = vadd.f32 %v849_v16, %v848_v10  ;;  %v117_v9 = vld [vmem:[#allocation10 + $0x78] sm:$0xff] }
 0x148   :  { %v803_v19 = vpop.f32.mrf.mxu0  ;;  %v851_v20 = vpop.f32.mrf.mxu1  ;;  %v133_v11 = vld [vmem:[#allocation10 + $0xf8] sm:$0xff] }
 0x149   :  { %v624_v21 = vadd.f32 %v802_v17, %v111_v13  ;;  %v640_v22 = vadd.f32 %v850_v18, %v127_v15 }
 0x14a   :  { %v804_v24 = vpop.f32.mrf.mxu0  ;;  %v852_v26 = vpop.f32.mrf.mxu1 }
 0x14b   :  { %656 = vst [vmem:[#allocation10 + $0x48] sm:$0xff] %v624_v21  ;;  %672 = vst [vmem:[#allocation10 + $0xc8] sm:$0xff] %v640_v22  ;;  %v805_v27 = vadd.f32 %v804_v24, %v803_v19  ;;  %v853_v28 = vadd.f32 %v852_v26, %v851_v20 }
 0x14c   :  { %v806_v29 = vpop.f32.mrf.mxu0  ;;  %v854_v30 = vpop.f32.mrf.mxu1 }
 0x14d   :  { %v625_v31 = vadd.f32 %v805_v27, %v112_v23  ;;  %v641_v32 = vadd.f32 %v853_v28, %v128_v25 }
 0x14e   :  { %v807_v34 = vpop.f32.mrf.mxu0  ;;  %v855_v36 = vpop.f32.mrf.mxu1 }
 0x14f   :  { %657 = vst [vmem:[#allocation10 + $0x50] sm:$0xff] %v625_v31  ;;  %673 = vst [vmem:[#allocation10 + $0xd0] sm:$0xff] %v641_v32  ;;  %v808_v37 = vadd.f32 %v807_v34, %v806_v29  ;;  %v856_v38 = vadd.f32 %v855_v36, %v854_v30 }
 0x150   :  { %v809_v39 = vpop.f32.mrf.mxu0  ;;  %v857_v40 = vpop.f32.mrf.mxu1 }
 0x151   :  { %v626_v41 = vadd.f32 %v808_v37, %v113_v33  ;;  %v642_v42 = vadd.f32 %v856_v38, %v129_v35 }
 0x152   :  { %v810_v44 = vpop.f32.mrf.mxu0  ;;  %v858_v46 = vpop.f32.mrf.mxu1 }
 0x153   :  { %658 = vst [vmem:[#allocation10 + $0x58] sm:$0xff] %v626_v41  ;;  %674 = vst [vmem:[#allocation10 + $0xd8] sm:$0xff] %v642_v42  ;;  %v811_v47 = vadd.f32 %v810_v44, %v809_v39  ;;  %v859_v48 = vadd.f32 %v858_v46, %v857_v40 }
 0x154   :  { %v812_v49 = vpop.f32.mrf.mxu0  ;;  %v860_v50 = vpop.f32.mrf.mxu1 }
 0x155   :  { %v627_v51 = vadd.f32 %v811_v47, %v114_v43  ;;  %v643_v52 = vadd.f32 %v859_v48, %v130_v45 }
 0x156   :  { %v813_v54 = vpop.f32.mrf.mxu0  ;;  %v861_v56 = vpop.f32.mrf.mxu1 }
 0x157   :  { %659 = vst [vmem:[#allocation10 + $0x60] sm:$0xff] %v627_v51  ;;  %675 = vst [vmem:[#allocation10 + $0xe0] sm:$0xff] %v643_v52  ;;  %v814_v57 = vadd.f32 %v813_v54, %v812_v49  ;;  %v862_v58 = vadd.f32 %v861_v56, %v860_v50 }
 0x158   :  { %v815_v59 = vpop.f32.mrf.mxu0  ;;  %v863_v60 = vpop.f32.mrf.mxu1 }
 0x159   :  { %v628_v61 = vadd.f32 %v814_v57, %v115_v53  ;;  %v644_v62 = vadd.f32 %v862_v58, %v131_v55 }
 0x15a   :  { %v816_v0 = vpop.f32.mrf.mxu0  ;;  %v864_v2 = vpop.f32.mrf.mxu1 }
 0x15b   :  { %660 = vst [vmem:[#allocation10 + $0x68] sm:$0xff] %v628_v61  ;;  %676 = vst [vmem:[#allocation10 + $0xe8] sm:$0xff] %v644_v62  ;;  %v817_v3 = vadd.f32 %v816_v0, %v815_v59  ;;  %v865_v4 = vadd.f32 %v864_v2, %v863_v60 }
 0x15c   :  { %v818_v5 = vpop.f32.mrf.mxu0  ;;  %v866_v6 = vpop.f32.mrf.mxu1 }
 0x15d   :  { %v629_v7 = vadd.f32 %v817_v3, %v116_v63  ;;  %v645_v8 = vadd.f32 %v865_v4, %v132_v1 }
 0x15e   :  { %v819_v10 = vpop.f32.mrf.mxu0  ;;  %v867_v12 = vpop.f32.mrf.mxu1 }
 0x15f   :  { %661 = vst [vmem:[#allocation10 + $0x70] sm:$0xff] %v629_v7  ;;  %677 = vst [vmem:[#allocation10 + $0xf0] sm:$0xff] %v645_v8  ;;  %v820_v13 = vadd.f32 %v819_v10, %v818_v5  ;;  %v868_v14 = vadd.f32 %v867_v12, %v866_v6 }
 0x161   :  { %v630_v15 = vadd.f32 %v820_v13, %v117_v9  ;;  %v646_v16 = vadd.f32 %v868_v14, %v133_v11 }
 0x163   :  { %662 = vst [vmem:[#allocation10 + $0x78] sm:$0xff] %v630_v15  ;;  %678 = vst [vmem:[#allocation10 + $0xf8] sm:$0xff] %v646_v16 }
 0x164 PF:  { %s1034_s1 = smov [#allocation10]  }
 0x165   :  { %s684_s22 = sshll.u32 %s1034_s1, 4  ;;  %s685_s22 = int_to_ptr.vmem [resolvable:$true] %s684_s22 }
 0x166   :  { %s1001_s23 = scalar_lea.vmem %s685_s22, 4096  ;;  %p1006_p8 = scmp.lt.s32.totalorder %s685_s22, %s685_s22 }
 0x167   :  { %p1002_p7 = scmp.ne.s32.totalorder %s685_s22, %s1001_s23  ;;  %p1007_p9 = scmp.lt.s32.totalorder %s1001_s23, %s1001_s23 }
 0x169   :  { %p1008_p10 = por %p1007_p9, %p1006_p8 }
 0x16b   :  { %p1009_p11 = pnand %p1008_p10, %p1002_p7 }
 0x16d   :  { %1012 = shalt.err (!%p1009_p11)
}
 0x16e   :  { %690 = dma.vmem_to_hbm [thread:$0]  %s685_s22, 4096, %s1100_s4, [#allocation7], %s1028_s0, %s1028_s0, %s1029_s7  }
 0x16f   :  { %1025 = dma.done.wait [#allocation7], 4096  }
 0x170   :  { %1026 = vsyncadd [#allocation7], 4294963200 }
 0x171   :  { %694 = vsyncpa [#allocation6], 1 }
 0x172   :  { %695 = vsyncpa [#allocation9], 1 }
 0x173   :  { %696 = vsyncpa [#allocation7], 1 }

</bundles_post_ra>
